<compile_context>
chip_gen: v6e
topology: v6e:2x2x1
jax: 0.10.0
libtpu: 0.0.40
codegen_flags: <defaults>
</compile_context>

<pallas_src>
import jax
import jax.numpy as jnp
from jax.experimental import pallas as pl
from jax.experimental.pallas import tpu as pltpu


# ---------------------------------------------------------------------------
# helpers
# ---------------------------------------------------------------------------
def _round_up(x, m):
    return ((x + m - 1) // m) * m


def _vmem_capacity_bytes():
    try:
        return int(pltpu.get_tpu_info().vmem_capacity_bytes)
    except Exception:
        return 64 * 1024 * 1024  # conservative default: v7x per-TC VMEM


def _tn_candidates(e_pad):
    cands = {e_pad}
    for t in (2048, 1024, 512, 256, 128):
        if e_pad % t == 0:
            cands.add(t)
    return sorted(cands, reverse=True)  # all multiples of 128 (e_pad is)


def _pick_tiles(m, e_pad, k_pad, in_bytes, out_bytes, vmem_cap):
    """Pick (tm, tn, m_pad): big lane-dense tiles, weight-resident when possible."""
    cands = _tn_candidates(e_pad)
    weight_bytes = k_pad * e_pad * in_bytes
    # Keep the whole weight slab resident (grid_n == 1) whenever it is small.
    if weight_bytes <= (8 << 20):
        tn = e_pad
    else:
        tn = max(t for t in cands if t <= 1024)

    # Row tile: large (amortizes ~0.35us/step), multiple of 16 so the bf16
    # patch block's sublane dim matches packed-pair rows.
    tm_max = 2048 if vmem_cap >= (100 << 20) else 1024
    tm = min(_round_up(max(m, 16), 16), tm_max)

    def working_set(tm_, tn_):  # double-buffered VMEM use of the pipeline
        return 2 * (tm_ * k_pad * in_bytes        # patch tile
                    + k_pad * tn_ * in_bytes      # weight slab
                    + 8 * tn_ * 4                 # bias (sublane-padded)
                    + tm_ * tn_ * out_bytes)      # output tile

    budget = int(0.6 * vmem_cap)
    while working_set(tm, tn) > budget and tm > 256:
        tm = _round_up(tm // 2, 16)
    while working_set(tm, tn) > budget and tn > min(cands):
        tn = max(t for t in cands if t < tn)
    while working_set(tm, tn) > budget and tm > 16:
        tm = _round_up(tm // 2, 16)

    # v7x has 2 TensorCores: guarantee >=2 grid steps on a 'parallel' axis.
    if (_round_up(m, tm) // tm) * (e_pad // tn) < 2 and tm >= 32:
        tm = _round_up(tm // 2, 16)

    return tm, tn, _round_up(m, tm)


# ---------------------------------------------------------------------------
# Pallas kernel: one (tm x tn) output tile = patches tile @ weight slab + bias
# ---------------------------------------------------------------------------
def _patch_proj_kernel(p_ref, w_ref, b_ref, o_ref):
    # p_ref: (tm, Kp) compute dtype   patch rows
    # w_ref: (Kp, tn) compute dtype   projection weight slab
    # b_ref: (1,  tn) f32             bias
    # o_ref: (tm, tn) out dtype       output tile (bf16 by default)
    acc = jnp.dot(p_ref[...], w_ref[...], preferred_element_type=jnp.float32)
    o_ref[...] = (acc + b_ref[...]).astype(o_ref.dtype)


def patch_proj_matmul(patches, weight_t, bias2d, *, tm, tn, out_dtype,
                      vmem_cap):
    """patches: (M_pad, Kp), weight_t: (Kp, Ep), bias2d: (1, Ep) -> (M_pad, Ep)."""
    m_pad, k_pad = patches.shape
    kw, e_pad = weight_t.shape
    assert kw == k_pad and m_pad % tm == 0 and e_pad % tn == 0
    grid_m, grid_n = m_pad // tm, e_pad // tn

    in_b = patches.dtype.itemsize
    w_b = weight_t.dtype.itemsize
    out_b = jnp.dtype(out_dtype).itemsize

    cost = pl.CostEstimate(
        flops=2 * m_pad * k_pad * e_pad,
        transcendentals=0,
        bytes_accessed=(m_pad * k_pad * in_b + k_pad * e_pad * w_b
                        + e_pad * 4 + m_pad * e_pad * out_b),
    )

    vmem_need = 2 * (tm * k_pad * in_b + k_pad * tn * w_b + 8 * tn * 4
                     + tm * tn * out_b)
    vmem_limit = int(min(max(vmem_need + (8 << 20), 32 << 20),
                         (3 * vmem_cap) // 4))

    # Grid order (grid_n, grid_m): row index varies fastest, so the weight and
    # bias block indices are invariant over the inner loop -> fetched once per
    # j instead of once per grid step.
    return pl.pallas_call(
        _patch_proj_kernel,
        out_shape=jax.ShapeDtypeStruct((m_pad, e_pad), out_dtype),
        grid=(grid_n, grid_m),
        in_specs=[
            pl.BlockSpec((tm, k_pad), lambda j, i: (i, 0)),   # patch rows
            pl.BlockSpec((k_pad, tn), lambda j, i: (0, j)),   # weight slab
            pl.BlockSpec((1, tn), lambda j, i: (0, j)),       # bias slab
        ],
        out_specs=pl.BlockSpec((tm, tn), lambda j, i: (i, j)),
        compiler_params=pltpu.CompilerParams(
            dimension_semantics=("parallel", "parallel"),
            vmem_limit_bytes=vmem_limit,
        ),
        cost_estimate=cost,
    )(patches, weight_t, bias2d)


# ---------------------------------------------------------------------------
# PatchEmbed module equivalent
# ---------------------------------------------------------------------------
class PatchEmbedPallas:
    def __init__(self, img_size, patch_size, frames=16, embed_dim=1024,
                 in_chans=1, key=None, dtype=jnp.float32,
                 compute_dtype=jnp.bfloat16, out_dtype=None):
        assert img_size[1] % patch_size[2] == 0
        assert img_size[0] % patch_size[1] == 0
        assert frames % patch_size[0] == 0
        self.img_size = img_size
        self.patch_size = patch_size
        self.frames = frames
        self.embed_dim = embed_dim
        self.in_chans = in_chans
        self.compute_dtype = compute_dtype
        # bf16 output by default (halves the dominant HBM writeback); the MXU
        # accumulation and the bias add stay f32 inside the kernel.
        self.out_dtype = compute_dtype if out_dtype is None else out_dtype
        self.input_size = (frames // patch_size[0],
                           img_size[0] // patch_size[1],
                           img_size[1] // patch_size[2])
        self.grid_size = (img_size[0] // patch_size[1],
                          img_size[1] // patch_size[2])
        self.num_patches = (self.input_size[0] * self.input_size[1]
                            * self.input_size[2])

        pt, ph, pw = patch_size
        self.K = in_chans * pt * ph * pw
        # No 128-padding of the contraction dim (pure bandwidth waste when K
        # is small); only round up to a sublane multiple as cheap insurance.
        self.K_pad = _round_up(self.K, 8)
        # Lane-dense embed dim: pad E to a multiple of 128 so output stores
        # are full-width vst; the pad is sliced off outside the kernel.
        self.E_pad = _round_up(embed_dim, 128)

        # Deterministic parameter init (Conv3d weight/bias shapes, f32).
        k_w, k_b = jax.random.split(key if key is not None
                                    else jax.random.PRNGKey(0))
        bound = self.K ** -0.5
        self.weight = jax.random.uniform(
            k_w, (embed_dim, in_chans, pt, ph, pw),
            minval=-bound, maxval=bound, dtype=dtype)
        self.bias = jax.random.uniform(
            k_b, (embed_dim,), minval=-bound, maxval=bound, dtype=dtype)

        # Pre-transpose / pad / cast the matmul operands ONCE at init:
        # (E, C, pt, ph, pw) -> (K, E) -> (Kp, Ep) in compute dtype.
        w2d = self.weight.reshape(embed_dim, self.K).T
        w2d = jnp.pad(w2d, ((0, self.K_pad - self.K),
                            (0, self.E_pad - embed_dim)))
        self.weight_t = w2d.astype(compute_dtype)
        self.bias2d = jnp.pad(self.bias, (0, self.E_pad - embed_dim)
                              ).reshape(1, self.E_pad).astype(jnp.float32)

        self._vmem_cap = _vmem_capacity_bytes()

    def __call__(self, x):
        # x: (B, C, T, H, W)
        B, C, T, H, W = x.shape
        assert H == self.img_size[0] and W == self.img_size[1]
        assert T == self.frames and C == self.in_chans
        pt, ph, pw = self.patch_size
        Tp, Hp, Wp = T // pt, H // ph, W // pw
        E, Ep = self.embed_dim, self.E_pad
        K, Kp = self.K, self.K_pad
        M = B * Tp * Hp * Wp

        # --- glue: extract non-overlapping patches (one fused XLA copy:
        # cast->bf16 + reshape + transpose + row pad) -----------------------
        # (B, C, Tp, pt, Hp, ph, Wp, pw) -> (B, Tp, Hp, Wp, C, pt, ph, pw)
        # TODO(synk): fuse this im2col copy into the kernel if xprof shows it
        # dominating (would need strided reads of x inside the kernel).
        xp = x.astype(self.compute_dtype).reshape(
            B, C, Tp, pt, Hp, ph, Wp, pw)
        xp = jnp.transpose(xp, (0, 2, 4, 6, 1, 3, 5, 7))
        patches = xp.reshape(M, K)

        out_b = jnp.dtype(self.out_dtype).itemsize
        tm, tn, M_pad = _pick_tiles(M, Ep, Kp, self.weight_t.dtype.itemsize,
                                    out_b, self._vmem_cap)
        if M_pad != M or Kp != K:
            patches = jnp.pad(patches, ((0, M_pad - M), (0, Kp - K)))

        # --- hot path: Pallas matmul + bias (f32 accumulate) ---------------
        out = patch_proj_matmul(patches, self.weight_t, self.bias2d,
                                tm=tm, tn=tn, out_dtype=self.out_dtype,
                                vmem_cap=self._vmem_cap)
        out = out[:M, :E]

        # (M, E) -> (B, Tp, Hp*Wp, E)   == torch.einsum('ncts->ntsc')
        return out.reshape(B, Tp, Hp * Wp, E)


# ---------------------------------------------------------------------------
# Pure-JAX reference (conv_general_dilated, f32) for a sanity check.
# ---------------------------------------------------------------------------
def _ref_forward(x, weight, bias, patch_size):
    out = jax.lax.conv_general_dilated(
        x, weight,
        window_strides=tuple(patch_size),
        padding="VALID",
        dimension_numbers=("NCTHW", "OITHW", "NCTHW"),
    )  # (B, E, Tp, Hp, Wp)
    out = out + bias[None, :, None, None, None]
    B, E, Tp, Hp, Wp = out.shape
    out = out.reshape(B, E, Tp, Hp * Wp)          # flatten(3)
    return jnp.transpose(out, (0, 2, 3, 1))       # 'ncts->ntsc'


if __name__ == "__main__":
    # Small shapes consistent with the module.
    B, C = 2, 1
    img_size = (16, 16)
    patch_size = (2, 4, 4)     # (pt, ph, pw)
    frames = 8
    embed_dim = 32

    key = jax.random.PRNGKey(0)
    k_x, k_p = jax.random.split(key)
    x = jax.random.normal(
        k_x, (B, C, frames, img_size[0], img_size[1]), dtype=jnp.float32)

    mod = PatchEmbedPallas(img_size, patch_size, frames=frames,
                           embed_dim=embed_dim, in_chans=C, key=k_p)

    out = jax.block_until_ready(mod(x))

    # Shape check: (B, T', H'*W', E)
    Tp = frames // patch_size[0]
    S = (img_size[0] // patch_size[1]) * (img_size[1] // patch_size[2])
    assert out.shape == (B, Tp, S, embed_dim), out.shape
    assert out.dtype == mod.out_dtype

    # Numerical check against the f32 XLA conv reference (kernel uses bf16
    # inputs/outputs with f32 accumulation, hence the relaxed tolerance).
    ref = jax.block_until_ready(
        _ref_forward(x, mod.weight, mod.bias, patch_size))
    out_f32 = out.astype(jnp.float32)
    assert jnp.allclose(out_f32, ref, atol=5e-2, rtol=5e-2), (
        float(jnp.max(jnp.abs(out_f32 - ref))))

    print("KERNEL_OK")
</pallas_src>

<mosaic_0001>
module attributes {stable_mosaic.version = 11 : i64} {
  func.func @_patch_proj_kernel(%arg0: i32, %arg1: i32, %arg2: memref<64x32xbf16, #tpu.memory_space<vmem>>, %arg3: memref<32x128xbf16, #tpu.memory_space<vmem>>, %arg4: memref<1x128xf32, #tpu.memory_space<vmem>>, %arg5: memref<64x128xbf16, #tpu.memory_space<vmem>>) attributes {dimension_semantics = [#tpu.dimension_semantics<parallel>, #tpu.dimension_semantics<parallel>], iteration_bounds = array<i64: 1, 2>, scalar_prefetch = 0 : i64, scratch_operands = 0 : i64, tpu.core_type = #tpu.core_type<tc>, window_params = [{transform_indices = @transform_0, window_bounds = array<i64: 64, 32>}, {transform_indices = @transform_1, window_bounds = array<i64: 32, 128>}, {transform_indices = @transform_2, window_bounds = array<i64: 1, 128>}, {transform_indices = @transform_3, window_bounds = array<i64: 64, 128>}]} {
    %c0 = arith.constant 0 : index
    %c0_0 = arith.constant 0 : index
    %0 = vector.load %arg2[%c0, %c0_0] : memref<64x32xbf16, #tpu.memory_space<vmem>>, vector<64x32xbf16>
    %c0_1 = arith.constant 0 : index
    %c0_2 = arith.constant 0 : index
    %1 = vector.load %arg3[%c0_1, %c0_2] : memref<32x128xbf16, #tpu.memory_space<vmem>>, vector<32x128xbf16>
    %cst = arith.constant dense<0.000000e+00> : vector<64x128xf32>
    %2 = tpu.matmul %0, %1, %cst {dimension_numbers = #tpu.dot_dimension_numbers<[1], [0], [0], [1], [0, 0, 1, 1], [], []>} : vector<64x32xbf16>, vector<32x128xbf16>, vector<64x128xf32> -> vector<64x128xf32>
    %c0_3 = arith.constant 0 : index
    %c0_4 = arith.constant 0 : index
    %3 = vector.load %arg4[%c0_3, %c0_4] : memref<1x128xf32, #tpu.memory_space<vmem>>, vector<1x128xf32>
    %4 = vector.broadcast %3 : vector<1x128xf32> to vector<64x128xf32>
    %5 = arith.addf %2, %4 : vector<64x128xf32>
    %6 = arith.truncf %5 : vector<64x128xf32> to vector<64x128xbf16>
    %c0_5 = arith.constant 0 : index
    %c0_6 = arith.constant 0 : index
    %7 = vector.load %arg5[%c0_5, %c0_6] : memref<64x128xbf16, #tpu.memory_space<vmem>>, vector<64x128xbf16>
    tpu.vector_store %arg5[%c0_5, %c0_6], %6 {strides = array<i32>} : memref<64x128xbf16, #tpu.memory_space<vmem>>, vector<64x128xbf16>,
    return
  }
  func.func @transform_0(%arg0: i32, %arg1: i32) -> (i32, i32) {
    %c0_i32 = arith.constant 0 : i32
    %c0_i32_0 = arith.constant 0 : i32
    return %arg1, %c0_i32 : i32, i32
  }
  func.func @transform_1(%arg0: i32, %arg1: i32) -> (i32, i32) {
    %c0_i32 = arith.constant 0 : i32
    %c0_i32_0 = arith.constant 0 : i32
    return %c0_i32, %arg0 : i32, i32
  }
  func.func @transform_2(%arg0: i32, %arg1: i32) -> (i32, i32) {
    %c0_i32 = arith.constant 0 : i32
    %c0_i32_0 = arith.constant 0 : i32
    return %c0_i32, %arg0 : i32, i32
  }
  func.func @transform_3(%arg0: i32, %arg1: i32) -> (i32, i32) {
    %c0_i32 = arith.constant 0 : i32
    return %arg1, %arg0 : i32, i32
  }
}

</mosaic_0001>

<bundles_post_ra>
// kernel: tpu_custom_call.1
= control target key start
LH: loop header
LB: loop body
LE: loop exit
PB: predicated region body
PF: predicated region fallthrough
CT: control target
= control target key end

     0   :  { %8 = vsyncpa [#allocation3], 0  ;;  %s879_s0 = inlined_call_operand.vmem [shape: bf16[128,32], index: 0, kind: input, shape index: {}]   ;;  %s880_s1 = inlined_call_operand.vmem [shape: bf16[32,128], index: 1, kind: input, shape index: {}]   ;;  %s881_s2 = inlined_call_operand.vmem [shape: f32[1,128], index: 2, kind: input, shape index: {}]   ;;  %s882_s3 = inlined_call_operand.hbm [shape: bf16[128,128], index: 3, kind: output, shape index: {}]  }
   0x1   :  { %10 = vsyncpa [#allocation3 + $0x1], 0  ;;  %s753_s12 = smov 0   ;;  %s755_s13 = smov 0  }
   0x2   :  { %s757_s14 = smov 0   ;;  %s759_s15 = smov 0  }
   0x3   :  { %s761_s16 = smov 0   ;;  %s763_s17 = smov 0  }
   0x4 LB: > { %s501_s18 = sadd.s32 4294967295, %s728_s17   ;;  %s502_s19 = sadd.s32 4294967294, %s728_s17   ;;  %s728_s17 = sphi %s763_s17, %s16_s17   ;;  %s724_s16 = sphi %s761_s16, %s889_s16   ;;  %s720_s15 = sphi %s759_s15, %s888_s15   ;;  %s716_s14 = sphi %s757_s14, %s887_s14   ;;  %s712_s13 = sphi %s755_s13, %s886_s13   ;;  %s708_s12 = sphi %s753_s12, %s885_s12  }
   0x5   : > { %s25_s20 = sadd.s32 1, %s724_s16  ;;  %s115_s21 = sadd.s32 1, %s716_s14 }
   0x6   : > { %p26_p0 = scmp.ge.s32.totalorder %s25_s20, 2  ;;  %p125_p1 = scmp.ne.s32.totalorder %s716_s14, %s712_s13 }
   0x7   : > { %p126_p2 = scmp.eq.s32.totalorder %s501_s18, 1  ;;  %p131_p3 = scmp.ne.s32.totalorder %s712_s13, %s708_s12 }
   0x8   : > { %s891_s20 = smov (%p26_p0, %s25_s20), 0  ;;  %p132_p5 = scmp.eq.s32.totalorder %s502_s19, 1 }
   0x9   : > { %p793_p4 = por %p126_p2, %p125_p1  ;;  %s110_s23 = ssub.s32 %s724_s16, %s891_s20 }
   0xa   : > { %p507_p6 = scmp.ge.s32.totalorder %s728_s17, 1  ;;  %p113_p7 = scmp.eq.s32.totalorder %s110_s23, 0 }
   0xb   : > { %p800_p8 = por %p132_p5, %p131_p3  ;;  %p172_p9 = scmp.lt.s32.totalorder %s728_s17, 3 }
   0xc   : > { %s806_s25 = scalar_select %p113_p7, %s716_s14, %s115_s21  }
   0xd   : > { %p173_p10 = pnand %p507_p6, %p172_p9 }
   0xe   : > { %s509_s28 = sshll.u32 (!%p173_p10), %s720_s15, 3  ;;  %s200_s8 = sand.u32 (!%p173_p10), 1, %s712_s13  }
   0xf   : > { %176 = sbr.rel (%p173_p10) target bundleno = 246 (0xf6), region = 32  ;;  %p204_p11 = scmp.lt.s32.totalorder (!%p173_p10), %s509_s28, 15 }
  0x10   : > { %s508_s9 = sshll.u32 (!%p173_p10), %s200_s8, 5  ;;  %s543_s21 = sshll.u32 (!%p173_p10), %s720_s15, 9 }
  0x11   : > { %s202_s18 = scalar_lea.vmem (!%p173_p10), [#allocation2], %s508_s9  ;;  %s830_s15 = scalar_lea.hbm (!%p173_p10), %s882_s3, %s543_s21 }
  0x12   : > { %s402_s19 = sshll.u32 (!%p173_p10), %s202_s18, 4  ;;  %s834_s27 = scalar_lea.sflag (!%p173_p10), [#allocation3], %s200_s8  ;;  %s825_s19 = int_to_ptr.vmem [resolvable:$true] %s402_s19 }
  0x13   : > { %s730_s29 = smov (!%p173_p10), [#allocation2]  }
  0x14   : > { %v646_v0 = vld [vmem:[%s880_s1 + $0x8] sm:$0xff]   ;;  %v647_v1 = vld [vmem:[%s880_s1] sm:$0xff]   ;;  %s893_s28 = smov (!%p204_p11, %s509_s28), 15  ;;  %vm269_vm0 = vcmask 261120   ;;  %s656_s30 = sshll.u32 %s730_s29, 4  ;;  %s657_s30 = int_to_ptr.vmem [resolvable:$false] %s656_s30 }
  0x15   : > { %573 = vmatprep.subr.bf16.mxu0 %v646_v0  ;;  %585 = vmatprep.subr.bf16.mxu1 %v646_v0  ;;  %s510_s4 = sshll.u32 %s893_s28, 2  ;;  %v511_v8 = vld [vmem:[%s881_s2] ss:$0 sm:$0xff]  ;;  %s652_s28 = scalar_lea.vmem %s825_s19, 512 }
  0x16   : > { %574 = vmatpush3.bf16.msra.mxu0 %v646_v0  ;;  %587 = vmatpush3.bf16.msra.mxu1 %v646_v0  ;;  %s207_s7 = scalar_lea.vmem %s879_s0, %s510_s4  ;;  %p653_p12 = scmp.ne.s32.totalorder %s825_s19, %s652_s28 }
  0x17   : > { %575 = vmatprep.subr.bf16.mxu0 %v647_v1  ;;  %586 = vmatprep.subr.bf16.mxu1 %v647_v1  ;;  %v648_v2 = vld [vmem:[%s207_s7] sm:$0xff]   ;;  %v649_v3 = vld [vmem:[%s207_s7 + $0x10] sm:$0xff]   ;;  %v650_v4 = vld [vmem:[%s207_s7 + $0x8] sm:$0xff]   ;;  %s658_s4 = scalar_lea.vmem %s657_s30, 1024  ;;  %p659_p1 = scmp.lt.s32.totalorder %s825_s19, %s657_s30 }
  0x18   : > { %577 = vmatprep.mubr.msk.bf16.mxu0 %vm269_vm0, %v648_v2  ;;  %581 = vmatprep.mubr.msk.bf16.mxu1 %vm269_vm0, %v649_v3  ;;  %v651_v5 = vld [vmem:[%s207_s7 + $0x18] sm:$0xff]   ;;  %p654_p13 = pnand %p653_p12, %p793_p4  ;;  %p660_p2 = scmp.lt.s32.totalorder %s658_s4, %s652_s28 }
  0x1a   : > { %576 = vmatpush3.bf16.msra.mxu0 %v647_v1  ;;  %588 = vmatpush3.bf16.msra.mxu1 %v647_v1  ;;  %p655_p0 = pneg %p654_p13  ;;  %p661_p3 = por %p660_p2, %p659_p1 }
  0x1c   : > { %p662_p5 = pnand %p661_p3, %p655_p0 }
  0x1d   : > { %578 = vmatmul.mubr.msk.bf16.vlgmr.msra.gmra.mxu0 %vm269_vm0, %v650_v4  ;;  %582 = vmatmul.mubr.msk.bf16.vlgmr.msra.gmra.mxu1 %vm269_vm0, %v651_v5 }
  0xdd   : > { %v579_v6 = vpop.f32.mrf.mxu0  ;;  %v583_v7 = vpop.f32.mrf.mxu1 }
  0xde   : > { %v325_v12 = vadd.f32 %v579_v6, %v511_v8  ;;  %v341_v15 = vadd.f32 %v583_v7, %v511_v8 }
  0xdf   : > { %v316_v9 = vpop.f32.mrf.mxu0  ;;  %v332_v10 = vpop.f32.mrf.mxu1 }
  0xe0   : > { %v317_v18 = vadd.f32 %v511_v8, %v316_v9  ;;  %v333_v22 = vadd.f32 %v511_v8, %v332_v10 }
  0xe1   : > { %v580_v11 = vpop.f32.mrf.mxu0  ;;  %v584_v14 = vpop.f32.mrf.mxu1 }
  0xe2   : > { %v328_v13 = vadd.f32 %v580_v11, %v511_v8  ;;  %v344_v16 = vadd.f32 %v584_v14, %v511_v8 }
  0xe3   : > { %v319_v17 = vpop.f32.mrf.mxu0  ;;  %v335_v21 = vpop.f32.mrf.mxu1 }
  0xe4   : > { %v552_v19 = vpack.c.bf16 %v328_v13, %v325_v12  ;;  %v320_v20 = vadd.f32 %v511_v8, %v319_v17  ;;  %v562_v23 = vpack.c.bf16 %v344_v16, %v341_v15  ;;  %v336_v24 = vadd.f32 %v511_v8, %v335_v21 }
  0xe6   : > { %564 = vst [vmem:[%s202_s18 + $0x8] sm:$0xff] %v552_v19   ;;  %v547_v25 = vpack.c.bf16 %v320_v20, %v317_v18  ;;  %566 = vst [vmem:[%s202_s18 + $0x18] sm:$0xff] %v562_v23   ;;  %v557_v26 = vpack.c.bf16 %v336_v24, %v333_v22 }
  0xe8   : > { %548 = vst [vmem:[%s202_s18] sm:$0xff] %v547_v25   ;;  %565 = vst [vmem:[%s202_s18 + $0x10] sm:$0xff] %v557_v26  }
  0xe9   : > { %665 = shalt.err (!%p662_p5)
}
  0xea   : > { %s666_s5 = scalar_lea.hbm %s830_s15, 512  ;;  %s670_s8 = scalar_lea.hbm %s882_s3, 1024 }
  0xeb   : > { %p667_p6 = scmp.ne.s32.totalorder %s830_s15, %s666_s5  ;;  %p671_p10 = scmp.lt.s32.totalorder %s830_s15, %s882_s3 }
  0xec   : > { %p672_p11 = scmp.lt.s32.totalorder %s670_s8, %s666_s5 }
  0xed   : > { %p668_p7 = pnand %p667_p6, %p793_p4 }
  0xee   : > { %p673_p12 = por %p672_p11, %p671_p10 }
  0xef   : > { %p669_p9 = pneg %p668_p7 }
  0xf1   : > { %p674_p13 = pnand %p673_p12, %p669_p9 }
  0xf3   : > { %677 = shalt.err (!%p674_p13)
}
  0xf4   : > { %s731_s11 = smov 64   ;;  %s732_s18 = smov 4  }
  0xf5   : > { %589 = dma.vmem_to_hbm [thread:$0]  (%p793_p4), %s825_s19, 512, %s830_s15, %s834_s27, %s731_s11, %s731_s11, %s732_s18  }
  0xf6 PF: > { %p595_p0 = scmp.ge.s32.totalorder %s728_s17, 2  ;;  %s417_s21 = sand.u32 1, %s708_s12  }
  0xf7   : > { %s418_s23 = scalar_lea.sflag [#allocation3], %s417_s21 }
  0xf8   : > { %p592_p1 = pnand %p595_p0, %p800_p8 }
  0xfa   : > { %p593_p2 = pneg %p592_p1 }
  0xfc   : > { %703 = dma.done.wait (%p593_p2), %s418_s23, 512  }
  0xfd   : > { %705 = vsyncadd (%p593_p2), %s418_s23, 4294966784  ;;  %s16_s17 = sadd.s32 1, %s728_s17   ;;  %s885_s12 = smov %s712_s13 }
  0xfe   : > { %p13_p3 = scmp.ge.s32.totalorder %s16_s17, 4   ;;  %s886_s13 = smov %s716_s14 }
  0xff   : > { %s887_s14 = smov %s806_s25  ;;  %s888_s15 = smov %s724_s16 }
 0x100   : > { %s889_s16 = smov %s891_s20  ;;  %15 = sbr.rel (!%p13_p3) target bundleno = 4 (0x4), region = 73 }
 0x105   :  { %423 = vsyncpa [#allocation3], 1 }
 0x106   :  { %425 = vsyncpa [#allocation3 + $0x1], 1 }

</bundles_post_ra>
